<compile_context>
chip_gen: v5e
topology: v5e:2x2
jax: 0.10.0
libtpu: 0.0.40
codegen_flags: <defaults>
</compile_context>

<pallas_src>
from functools import partial

import numpy as np
import jax
import jax.numpy as jnp
from jax import lax
from jax.experimental import pallas as pl
from jax.experimental.pallas import tpu as pltpu


def _gated_conv_kernel(x_ref, m_ref, b_ref, out_ref, *, B, H, W, C, O, KH, pad):
    """Fused gated conv, B images per grid step.

    x_ref  : (B, H, W*C)        input rows, (w, c) folded onto the lane axis
    m_ref  : (KH, W*C, 2*W*O)   banded fused conv weights [tanh | sigmoid],
                                horizontal padding folded in (edge taps zero)
    b_ref  : (1, 2*W*O)         fused bias (tiled over w), f32
    out_ref: (B, H, W*O)        gated output, lane-dense
    """
    WO = W * O
    WC = W * C
    BH = B * H

    # One cast, once per step; (B,H,WC)->(BH,WC) merge is layout-preserving
    # (H is a multiple of the 8-row sublane tile).
    x = x_ref[...].reshape(BH, WC).astype(m_ref.dtype)

    # Row index within each packed image, for masking vertically-shifted taps.
    row = lax.broadcasted_iota(jnp.int32, (BH, 1), 0) % H

    # KH banded matmuls over M = B*H rows, single fused f32 accumulator.
    acc = jnp.zeros((BH, 2 * WO), jnp.float32)
    for kh in range(KH):                          # static unroll (KH = 3)
        d = kh - pad                              # vertical tap offset
        if d == 0:
            lhs = x
        else:
            # Sublane rotate (XLU) + boundary-row mask replaces the padded
            # scratch and its unaligned sublane slices. Rows that would read
            # across an image boundary (or the global wrap) are zeroed, which
            # is exactly the vertical zero-padding of a "same" conv.
            shifted = pltpu.roll(x, shift=(-d) % BH, axis=0)
            keep = jnp.logical_and(row + d >= 0, row + d < H)
            lhs = jnp.where(keep, shifted, jnp.zeros_like(shifted))
        acc += jnp.dot(lhs, m_ref[kh], preferred_element_type=jnp.float32)

    # Epilogue: one broadcast bias add, EUP activations, gating, dense store.
    acc += b_ref[...]                             # (1, 2WO) -> (BH, 2WO)
    t = jnp.tanh(acc[:, :WO])                     # first 128-lane tile  (tanh)
    s = jax.nn.sigmoid(acc[:, WO:])               # second 128-lane tile (sigm)
    out_ref[...] = (t * s).reshape(B, H, WO).astype(out_ref.dtype)


def prepare_gated_conv(w_tanh, b_tanh, w_sig, b_sig, W, *, padding=1,
                       compute_dtype=jnp.float32):
    """Build the fused banded weight matrix + fused bias once per weight set.

    M[kh, wi*C + c, w*O + o] = w[o, c, kh, wi - w + padding]
                               if 0 <= wi - w + padding < KW else 0
    (horizontal zero-padding is folded into the band via the zero edge taps).
    """
    O, C, KH, KW = w_tanh.shape

    def band(w):
        wk = jnp.transpose(w, (3, 2, 1, 0))                     # (KW, KH, C, O)
        # shift[kw, wi, w] = 1 iff w == wi + padding - kw  (inside [0, W))
        shift = jnp.stack(
            [jnp.eye(W, W, k=padding - kw, dtype=w.dtype) for kw in range(KW)])
        m = jnp.einsum('xhco,xpw->hpcwo', wk, shift)            # (KH,Wi,C,Wo,O)
        return m.reshape(KH, W * C, W * O)

    # Fused columns: [ tanh branch (W*O) | sigmoid branch (W*O) ]
    M = jnp.concatenate([band(w_tanh), band(w_sig)],
                        axis=-1).astype(compute_dtype)          # (KH,W*C,2WO)
    bias = jnp.concatenate([jnp.tile(b_tanh, W), jnp.tile(b_sig, W)]
                           ).reshape(1, 2 * W * O).astype(jnp.float32)
    return M, bias


def _pick_block_batch(N, H, target_rows=256):
    """Largest divisor of N with B*H <= target_rows, keeping >= 2 grid steps
    when N >= 2 (so v7x megacore can shard the batch axis across both TCs)."""
    best = 1
    for b in range(1, N + 1):
        if N % b:
            continue
        if b * H > target_rows:
            break
        if N >= 2 and N // b < 2:
            break
        best = b
    return best


def gated_activation(x_nchw, w_tanh, b_tanh, w_sig, b_sig, *, padding=1,
                     compute_dtype=None, block_batch=None, params=None):
    """tanh(conv2d(x, w_tanh)+b_tanh) * sigmoid(conv2d(x, w_sig)+b_sig).

    x_nchw : (N, C, H, W)    PyTorch NCHW
    w_*    : (O, C, KH, KW)  PyTorch OIHW
    b_*    : (O,)
    compute_dtype: dtype of the MXU operands (jnp.bfloat16 recommended on
                   v5e/v6e/v7x); accumulation, bias and activations stay f32.
    params : optional precomputed (M, bias) from prepare_gated_conv (hoist out
             of the per-call path when reusing weights).
    returns (N, O, H, W)
    """
    N, C, H, W = x_nchw.shape
    O, Cw, KH, KW = w_tanh.shape
    assert Cw == C and w_sig.shape == w_tanh.shape
    assert KH == 2 * padding + 1 and KW == 2 * padding + 1, "same-conv only"
    if compute_dtype is None:
        compute_dtype = x_nchw.dtype

    if params is None:
        params = prepare_gated_conv(w_tanh, b_tanh, w_sig, b_sig, W,
                                    padding=padding, compute_dtype=compute_dtype)
    M, bias = params

    if block_batch is None:
        block_batch = _pick_block_batch(N, H)
    B = block_batch
    assert N % B == 0, "block_batch must divide the batch"

    # Layout glue: NCHW -> (N, H, W*C). No padding pass (folded into the band
    # horizontally, handled by roll+mask vertically).
    x = jnp.transpose(x_nchw, (0, 2, 3, 1)).reshape(N, H, W * C)

    kernel = partial(_gated_conv_kernel,
                     B=B, H=H, W=W, C=C, O=O, KH=KH, pad=padding)

    out = pl.pallas_call(
        kernel,
        out_shape=jax.ShapeDtypeStruct((N, H, W * O), x_nchw.dtype),
        grid_spec=pltpu.PrefetchScalarGridSpec(
            num_scalar_prefetch=0,
            grid=(N // B,),
            in_specs=[
                pl.BlockSpec((B, H, W * C), lambda n: (n, 0, 0)),
                pl.BlockSpec((KH, W * C, 2 * W * O), lambda n: (0, 0, 0)),
                pl.BlockSpec((1, 2 * W * O), lambda n: (0, 0)),
            ],
            out_specs=pl.BlockSpec((B, H, W * O), lambda n: (n, 0, 0)),
        ),
        compiler_params=pltpu.CompilerParams(
            dimension_semantics=("parallel",),
            vmem_limit_bytes=32 * 1024 * 1024),
    )(x, M, bias)

    out = out.reshape(N, H, W, O)                 # (w, o) back apart
    return jnp.transpose(out, (0, 3, 1, 2))       # NHWC -> NCHW


def _reference(x_nchw, w_tanh, b_tanh, w_sig, b_sig, *, padding=1):
    """Plain-JAX reference matching PyTorch Conv2d semantics."""
    dn = lax.conv_dimension_numbers(x_nchw.shape, w_tanh.shape,
                                    ('NCHW', 'OIHW', 'NCHW'))

    def conv(w, b):
        y = lax.conv_general_dilated(x_nchw, w, (1, 1),
                                     [(padding, padding), (padding, padding)],
                                     dimension_numbers=dn)
        return y + b.reshape(1, -1, 1, 1)

    return jnp.tanh(conv(w_tanh, b_tanh)) * jax.nn.sigmoid(conv(w_sig, b_sig))


if __name__ == "__main__":
    # Small shapes consistent with the module's conv blocks:
    # NCHW input, Conv2d(C=4 -> O=8, kernel_size=3, padding=1).
    N, C, H, W = 2, 4, 16, 16
    O, K = 8, 3

    key = jax.random.PRNGKey(0)
    k_x, k_wt, k_bt, k_ws, k_bs = jax.random.split(key, 5)

    x = jax.random.normal(k_x, (N, C, H, W), jnp.float32)

    # Deterministic Conv2d-style init: U(-1/sqrt(fan_in), 1/sqrt(fan_in)).
    bound = 1.0 / np.sqrt(C * K * K)
    w_tanh = jax.random.uniform(k_wt, (O, C, K, K), jnp.float32, -bound, bound)
    b_tanh = jax.random.uniform(k_bt, (O,), jnp.float32, -bound, bound)
    w_sig = jax.random.uniform(k_ws, (O, C, K, K), jnp.float32, -bound, bound)
    b_sig = jax.random.uniform(k_bs, (O,), jnp.float32, -bound, bound)

    ref = jax.block_until_ready(
        _reference(x, w_tanh, b_tanh, w_sig, b_sig, padding=1))

    # f32 MXU-operand path, 1 image / step (grid=2 -> both v7x TensorCores).
    out = jax.block_until_ready(
        gated_activation(x, w_tanh, b_tanh, w_sig, b_sig, padding=1))
    assert out.shape == (N, O, H, W)
    assert np.allclose(np.asarray(out), np.asarray(ref), atol=1e-4, rtol=1e-4)

    # Batch-packed path: both images fused into one M=32-row matmul per step
    # (exercises the roll+mask image-boundary handling).
    out_packed = jax.block_until_ready(
        gated_activation(x, w_tanh, b_tanh, w_sig, b_sig, padding=1,
                         block_batch=2))
    assert np.allclose(np.asarray(out_packed), np.asarray(ref),
                       atol=1e-4, rtol=1e-4)

    # bf16 MXU-operand path (f32 accumulation/activations) for v5e/v6e/v7x.
    out_bf16 = jax.block_until_ready(
        gated_activation(x, w_tanh, b_tanh, w_sig, b_sig, padding=1,
                         compute_dtype=jnp.bfloat16))
    assert np.allclose(np.asarray(out_bf16), np.asarray(ref),
                       atol=3e-2, rtol=3e-2)

    print("KERNEL_OK")
</pallas_src>

<mosaic_0001>
module attributes {stable_mosaic.version = 11 : i64} {
  func.func @_gated_conv_kernel(%arg0: i32, %arg1: memref<1x16x64xf32, #tpu.memory_space<vmem>>, %arg2: memref<3x64x256xf32, #tpu.memory_space<vmem>>, %arg3: memref<1x256xf32, #tpu.memory_space<vmem>>, %arg4: memref<1x16x128xf32, #tpu.memory_space<vmem>>) attributes {dimension_semantics = [#tpu.dimension_semantics<parallel>], iteration_bounds = array<i64: 2>, scalar_prefetch = 0 : i64, scratch_operands = 0 : i64, tpu.core_type = #tpu.core_type<tc>, window_params = [{transform_indices = @transform_0, window_bounds = array<i64: 1, 16, 64>}, {pipeline_mode = #tpu.pipeline_mode<synchronous>, transform_indices = @transform_1, window_bounds = array<i64: 3, 64, 256>}, {pipeline_mode = #tpu.pipeline_mode<synchronous>, transform_indices = @transform_2, window_bounds = array<i64: 1, 256>}, {transform_indices = @transform_3, window_bounds = array<i64: 1, 16, 128>}]} {
    %c0 = arith.constant 0 : index
    %c0_0 = arith.constant 0 : index
    %c0_1 = arith.constant 0 : index
    %0 = vector.load %arg1[%c0, %c0_0, %c0_1] : memref<1x16x64xf32, #tpu.memory_space<vmem>>, vector<1x16x64xf32>
    %1 = vector.shape_cast %0 : vector<1x16x64xf32> to vector<16x64xf32>
    %2 = tpu.iota {dimensions = array<i32: 0>} : vector<16x1xi32>
    %c16_i32 = arith.constant 16 : i32
    %c0_i32 = arith.constant 0 : i32
    %3 = arith.cmpi eq, %c16_i32, %c0_i32 : i32
    %c1_i32 = arith.constant 1 : i32
    %4 = arith.select %3, %c1_i32, %c16_i32 : i32
    %5 = vector.broadcast %4 : i32 to vector<16x1xi32>
    %6 = arith.remsi %2, %5 : vector<16x1xi32>
    %c0_i32_2 = arith.constant 0 : i32
    %7 = vector.broadcast %c0_i32_2 : i32 to vector<16x1xi32>
    %8 = arith.cmpi ne, %6, %7 : vector<16x1xi32>
    %c0_i32_3 = arith.constant 0 : i32
    %9 = vector.broadcast %c0_i32_3 : i32 to vector<16x1xi32>
    %10 = arith.cmpi slt, %6, %9 : vector<16x1xi32>
    %c0_i32_4 = arith.constant 0 : i32
    %11 = arith.cmpi slt, %4, %c0_i32_4 : i32
    %12 = vector.broadcast %11 : i1 to vector<16x1xi1>
    %13 = vector.broadcast %12 : vector<16x1xi1> to vector<16x1xi1>
    %14 = arith.xori %10, %13 : vector<16x1xi1>
    %15 = arith.andi %14, %8 : vector<16x1xi1>
    %16 = vector.broadcast %4 : i32 to vector<16x1xi32>
    %17 = arith.addi %6, %16 : vector<16x1xi32>
    %18 = arith.select %15, %17, %6 : vector<16x1xi1>, vector<16x1xi32>
    %cst = arith.constant 0.000000e+00 : f32
    %19 = vector.broadcast %cst : f32 to vector<16x256xf32>
    %c1_i32_5 = arith.constant 1 : i32
    %20 = tpu.dynamic_rotate %1 by %c1_i32_5 dim 0 : vector<16x64xf32>, i32 -> vector<16x64xf32>
    %c-1_i32 = arith.constant -1 : i32
    %21 = vector.broadcast %c-1_i32 : i32 to vector<16x1xi32>
    %22 = arith.addi %18, %21 : vector<16x1xi32>
    %c0_i32_6 = arith.constant 0 : i32
    %23 = vector.broadcast %c0_i32_6 : i32 to vector<16x1xi32>
    %24 = arith.cmpi sge, %22, %23 : vector<16x1xi32>
    %c-1_i32_7 = arith.constant -1 : i32
    %25 = vector.broadcast %c-1_i32_7 : i32 to vector<16x1xi32>
    %26 = arith.addi %18, %25 : vector<16x1xi32>
    %c16_i32_8 = arith.constant 16 : i32
    %27 = vector.broadcast %c16_i32_8 : i32 to vector<16x1xi32>
    %28 = arith.cmpi slt, %26, %27 : vector<16x1xi32>
    %29 = arith.andi %24, %28 : vector<16x1xi1>
    %cst_9 = arith.constant 0.000000e+00 : f32
    %30 = vector.broadcast %cst_9 : f32 to vector<16x64xf32>
    %31 = vector.shape_cast %29 : vector<16x1xi1> to vector<16x1xi1>
    %32 = vector.broadcast %31 : vector<16x1xi1> to vector<16x64xi1>
    %33 = arith.select %32, %20, %30 : vector<16x64xi1>, vector<16x64xf32>
    %c0_10 = arith.constant 0 : index
    %c0_11 = arith.constant 0 : index
    %c0_12 = arith.constant 0 : index
    %34 = vector.load %arg2[%c0_10, %c0_11, %c0_12] : memref<3x64x256xf32, #tpu.memory_space<vmem>>, vector<1x64x256xf32>
    %35 = vector.shape_cast %34 : vector<1x64x256xf32> to vector<64x256xf32>
    %cst_13 = arith.constant dense<0.000000e+00> : vector<16x256xf32>
    %36 = tpu.matmul %33, %35, %cst_13 {dimension_numbers = #tpu.dot_dimension_numbers<[1], [0], [0], [1], [0, 0, 1, 1], [], []>} : vector<16x64xf32>, vector<64x256xf32>, vector<16x256xf32> -> vector<16x256xf32>
    %37 = arith.addf %19, %36 : vector<16x256xf32>
    %c1 = arith.constant 1 : index
    %c0_14 = arith.constant 0 : index
    %c0_15 = arith.constant 0 : index
    %38 = vector.load %arg2[%c1, %c0_14, %c0_15] : memref<3x64x256xf32, #tpu.memory_space<vmem>>, vector<1x64x256xf32>
    %39 = vector.shape_cast %38 : vector<1x64x256xf32> to vector<64x256xf32>
    %cst_16 = arith.constant dense<0.000000e+00> : vector<16x256xf32>
    %40 = tpu.matmul %1, %39, %cst_16 {dimension_numbers = #tpu.dot_dimension_numbers<[1], [0], [0], [1], [0, 0, 1, 1], [], []>} : vector<16x64xf32>, vector<64x256xf32>, vector<16x256xf32> -> vector<16x256xf32>
    %41 = arith.addf %37, %40 : vector<16x256xf32>
    %c15_i32 = arith.constant 15 : i32
    %42 = tpu.dynamic_rotate %1 by %c15_i32 dim 0 : vector<16x64xf32>, i32 -> vector<16x64xf32>
    %c1_i32_17 = arith.constant 1 : i32
    %43 = vector.broadcast %c1_i32_17 : i32 to vector<16x1xi32>
    %44 = arith.addi %18, %43 : vector<16x1xi32>
    %c0_i32_18 = arith.constant 0 : i32
    %45 = vector.broadcast %c0_i32_18 : i32 to vector<16x1xi32>
    %46 = arith.cmpi sge, %44, %45 : vector<16x1xi32>
    %c1_i32_19 = arith.constant 1 : i32
    %47 = vector.broadcast %c1_i32_19 : i32 to vector<16x1xi32>
    %48 = arith.addi %18, %47 : vector<16x1xi32>
    %c16_i32_20 = arith.constant 16 : i32
    %49 = vector.broadcast %c16_i32_20 : i32 to vector<16x1xi32>
    %50 = arith.cmpi slt, %48, %49 : vector<16x1xi32>
    %51 = arith.andi %46, %50 : vector<16x1xi1>
    %cst_21 = arith.constant 0.000000e+00 : f32
    %52 = vector.broadcast %cst_21 : f32 to vector<16x64xf32>
    %53 = vector.shape_cast %51 : vector<16x1xi1> to vector<16x1xi1>
    %54 = vector.broadcast %53 : vector<16x1xi1> to vector<16x64xi1>
    %55 = arith.select %54, %42, %52 : vector<16x64xi1>, vector<16x64xf32>
    %c2 = arith.constant 2 : index
    %c0_22 = arith.constant 0 : index
    %c0_23 = arith.constant 0 : index
    %56 = vector.load %arg2[%c2, %c0_22, %c0_23] : memref<3x64x256xf32, #tpu.memory_space<vmem>>, vector<1x64x256xf32>
    %57 = vector.shape_cast %56 : vector<1x64x256xf32> to vector<64x256xf32>
    %cst_24 = arith.constant dense<0.000000e+00> : vector<16x256xf32>
    %58 = tpu.matmul %55, %57, %cst_24 {dimension_numbers = #tpu.dot_dimension_numbers<[1], [0], [0], [1], [0, 0, 1, 1], [], []>} : vector<16x64xf32>, vector<64x256xf32>, vector<16x256xf32> -> vector<16x256xf32>
    %59 = arith.addf %41, %58 : vector<16x256xf32>
    %c0_25 = arith.constant 0 : index
    %c0_26 = arith.constant 0 : index
    %60 = vector.load %arg3[%c0_25, %c0_26] : memref<1x256xf32, #tpu.memory_space<vmem>>, vector<1x256xf32>
    %61 = vector.broadcast %60 : vector<1x256xf32> to vector<16x256xf32>
    %62 = arith.addf %59, %61 : vector<16x256xf32>
    %63 = vector.extract_strided_slice %62 {offsets = [0, 0], sizes = [16, 128], strides = [1, 1]} : vector<16x256xf32> to vector<16x128xf32>
    %64 = math.tanh %63 : vector<16x128xf32>
    %65 = vector.extract_strided_slice %62 {offsets = [0, 128], sizes = [16, 128], strides = [1, 1]} : vector<16x256xf32> to vector<16x128xf32>
    %66 = arith.negf %65 : vector<16x128xf32>
    %67 = math.exp %66 : vector<16x128xf32>
    %cst_27 = arith.constant 1.000000e+00 : f32
    %68 = vector.broadcast %cst_27 : f32 to vector<16x128xf32>
    %69 = arith.addf %68, %67 : vector<16x128xf32>
    %70 = arith.divf %68, %69 : vector<16x128xf32>
    %71 = arith.mulf %64, %70 : vector<16x128xf32>
    %72 = vector.shape_cast %71 : vector<16x128xf32> to vector<1x16x128xf32>
    %c0_28 = arith.constant 0 : index
    %c0_29 = arith.constant 0 : index
    %c0_30 = arith.constant 0 : index
    %73 = vector.load %arg4[%c0_28, %c0_29, %c0_30] : memref<1x16x128xf32, #tpu.memory_space<vmem>>, vector<1x16x128xf32>
    tpu.vector_store %arg4[%c0_28, %c0_29, %c0_30], %72 {strides = array<i32>} : memref<1x16x128xf32, #tpu.memory_space<vmem>>, vector<1x16x128xf32>,
    return
  }
  func.func @transform_0(%arg0: i32) -> (i32, i32, i32) {
    %c0_i32 = arith.constant 0 : i32
    %c0_i32_0 = arith.constant 0 : i32
    %c0_i32_1 = arith.constant 0 : i32
    return %arg0, %c0_i32, %c0_i32_0 : i32, i32, i32
  }
  func.func @transform_1(%arg0: i32) -> (i32, i32, i32) {
    %c0_i32 = arith.constant 0 : i32
    %c0_i32_0 = arith.constant 0 : i32
    %c0_i32_1 = arith.constant 0 : i32
    %c0_i32_2 = arith.constant 0 : i32
    return %c0_i32, %c0_i32_0, %c0_i32_1 : i32, i32, i32
  }
  func.func @transform_2(%arg0: i32) -> (i32, i32) {
    %c0_i32 = arith.constant 0 : i32
    %c0_i32_0 = arith.constant 0 : i32
    %c0_i32_1 = arith.constant 0 : i32
    return %c0_i32, %c0_i32_0 : i32, i32
  }
  func.func @transform_3(%arg0: i32) -> (i32, i32, i32) {
    %c0_i32 = arith.constant 0 : i32
    %c0_i32_0 = arith.constant 0 : i32
    %c0_i32_1 = arith.constant 0 : i32
    return %arg0, %c0_i32, %c0_i32_0 : i32, i32, i32
  }
}

</mosaic_0001>

<bundles_post_ra>
// kernel: tpu_custom_call.1
= control target key start
LH: loop header
LB: loop body
LE: loop exit
PB: predicated region body
PF: predicated region fallthrough
CT: control target
= control target key end

     0   :  { %8 = vsyncpa [#allocation3], 0  ;;  %s1170_s0 = inlined_call_operand.hbm [shape: f32[2,16,64], index: 0, kind: input, shape index: {}]   ;;  %s1171_s1 = inlined_call_operand.hbm [shape: f32[3,64,256], index: 1, kind: input, shape index: {}]   ;;  %s1172_s2 = inlined_call_operand.hbm [shape: f32[1,256], index: 2, kind: input, shape index: {}]   ;;  %s1173_s3 = inlined_call_operand.hbm [shape: f32[2,16,128], index: 3, kind: output, shape index: {}]  }
   0x1   :  { %10 = vsyncpa [#allocation3 + $0x1], 0 }
   0x2   :  { %11 = vsyncpa [#allocation6], 0 }
   0x3   :  { %12 = vsyncpa [#allocation4], 0 }
   0x4   :  { %14 = vsyncpa [#allocation4 + $0x1], 0  ;;  %s987_s12 = smov 0   ;;  %s989_s13 = smov 0  }
   0x5   :  { %s991_s14 = smov 0   ;;  %s993_s15 = smov 0  }
   0x6 LB: > { %s1008_s16 = sadd.s32 4294967295, %s957_s15   ;;  %s662_s17 = sadd.s32 4294967294, %s957_s15   ;;  %s957_s15 = sphi %s993_s15, %s1183_s15   ;;  %s953_s14 = sphi %s991_s14, %s1182_s14   ;;  %s949_s13 = sphi %s989_s13, %s1181_s13   ;;  %s945_s12 = sphi %s987_s12, %s1180_s12  }
   0x7   : > { %p40_p0 = scmp.ne.s32.totalorder %s949_s13, %s945_s12  ;;  %p41_p1 = scmp.eq.s32.totalorder %s1008_s16, 0 }
   0x8   : > { %p106_p2 = scmp.eq.s32.totalorder %s1008_s16, 1  ;;  %p112_p3 = scmp.eq.s32.totalorder %s662_s17, 1 }
   0x9   : > { %p1017_p4 = por %p41_p1, %p40_p0  ;;  %p663_p5 = scmp.ge.s32.totalorder %s957_s15, 1 }
   0xa   : > { %p1022_p6 = por %p112_p3, %p40_p0  ;;  %p119_p7 = scmp.lt.s32.totalorder %s957_s15, 3 }
   0xb   : > { %s130_s22 = sshll.u32 %s1171_s1, 4  ;;  %s959_s24 = smov [#allocation5]   ;;  %s131_s22 = int_to_ptr.hbm [resolvable:$true] %s130_s22 }
   0xc   : > { %p1030_p8 = pnand %p663_p5, %p119_p7  ;;  %s132_s25 = sshll.u32 %s959_s24, 4  ;;  %s133_s25 = int_to_ptr.vmem [resolvable:$true] %s132_s25 }
   0xd   : > { %s145_s28 = sshll.u32 %s1172_s2, 4  ;;  %s960_s29 = smov 256   ;;  %s146_s28 = int_to_ptr.hbm [resolvable:$true] %s145_s28 }
   0xe   : > { %p724_p9 = pneg %p1030_p8  ;;  %s961_s30 = smov 16  }
   0xf   : > { %s962_s4 = smov [#allocation7]   ;;  %s1043_s6 = sadd.s32 1, %s957_s15  }
  0x10   : > { %p725_p10 = pnand %p724_p9, %p41_p1  ;;  %s147_s5 = sshll.u32 %s962_s4, 4  ;;  %s148_s5 = int_to_ptr.vmem [resolvable:$true] %s147_s5 }
  0x11   : > { %s27_s7 = sadd.s32 1, %s953_s14  ;;  %s24_s8 = ssub.s32 %s957_s15, %s1043_s6 }
  0x12   : > { %727 = dma.hbm_to_vmem [thread:$0]  (!%p725_p10), %s131_s22, 6144, %s133_s25, [#allocation6], %s960_s29, %s960_s29, %s961_s30  }
  0x13   : > { %730 = dma.hbm_to_vmem [thread:$0]  (!%p725_p10), %s146_s28, 32, %s148_s5, [#allocation6]  }
  0x14   : > { %p34_p12 = scmp.ne.s32.totalorder %s953_s14, %s949_s13  ;;  %p25_p13 = scmp.eq.s32.totalorder %s24_s8, 0 }
  0x15   : > { %p35_p0 = scmp.eq.s32.totalorder %s957_s15, 0  ;;  %p741_p5 = scmp.lt.s32.totalorder %s957_s15, 2 }
  0x16   : > { %p1053_p3 = por %p106_p2, %p34_p12  ;;  %s158_s11 = sand.u32 1, %s953_s14  }
  0x17   : > { %s1059_s10 = scalar_select %p25_p13, %s953_s14, %s27_s7  }
  0x18   : > { %p36_p7 = por %p35_p0, %p34_p12  ;;  %s667_s17 = sshll.u32 %s158_s11, 4 }
  0x19   : > { %s694_s20 = sshll.u32 %s957_s15, 4  ;;  %s162_s25 = scalar_lea.vmem [#allocation2], %s667_s17 }
  0x1a   : > { %s167_s24 = scalar_lea.hbm %s1170_s0, %s694_s20  ;;  %s170_s26 = sshll.u32 %s162_s25, 4  ;;  %s171_s26 = int_to_ptr.vmem [resolvable:$true] %s170_s26 }
  0x1b   : > { %s168_s27 = sshll.u32 %s167_s24, 4  ;;  %p1066_p2 = pnand %p741_p5, %p36_p7  ;;  %s169_s27 = int_to_ptr.hbm [resolvable:$true] %s168_s27 }
  0x1c   : > { %s159_s29 = scalar_lea.sflag [#allocation3], %s158_s11  ;;  %s857_s30 = sshra.s32 %s169_s27, 4  ;;  %s858_s30 = int_to_ptr.hbm [resolvable:$true] %s857_s30 }
  0x1d   : > { %s859_s4 = scalar_lea.hbm %s858_s30, 16  ;;  %p861_p10 = pneg %p1066_p2 }
  0x1e   : > { %p860_p9 = scmp.ne.s32.totalorder %s858_s30, %s859_s4  ;;  %s864_s8 = scalar_lea.hbm %s1170_s0, 32 }
  0x1f   : > { %p865_p0 = scmp.lt.s32.totalorder %s858_s30, %s1170_s0  ;;  %p866_p5 = scmp.lt.s32.totalorder %s864_s8, %s859_s4 }
  0x20   : > { %p862_p12 = pnand %p861_p10, %p860_p9 }
  0x21   : > { %p867_p7 = por %p866_p5, %p865_p0 }
  0x22   : > { %p863_p13 = pneg %p862_p12 }
  0x24   : > { %p868_p11 = pnand %p867_p7, %p863_p13 }
  0x26   : > { %871 = shalt.err (!%p868_p11)
}
  0x27   : > { %s963_s11 = smov 128   ;;  %s964_s21 = smov 8  }
  0x28   : > { %734 = dma.hbm_to_vmem [thread:$0]  (!%p1066_p2), %s169_s27, 256, %s171_s26, %s159_s29, %s963_s11, %s963_s11, %s964_s21  }
  0x29   : > { %182 = sbr.rel (%p1030_p8) target bundleno = 252 (0xfc), region = 32  ;;  %s1083_s22 = sand.u32 (!%p1030_p8), 1, %s949_s13  }
  0x2a   : > { %s671_s24 = sshll.u32 (!%p1030_p8), %s1083_s22, 4  ;;  %s185_s25 = scalar_lea.sflag (!%p1030_p8), [#allocation3], %s1083_s22 }
  0x2b   : > { %s188_s30 = scalar_lea.vmem (!%p1030_p8), [#allocation2], %s671_s24 }
  0x2e   : > { %932 = dma.done.wait (%p1017_p4), %s185_s25, 256  }
  0x2f   : > { %934 = vsyncadd (%p1017_p4), %s185_s25, 4294967040 }
  0x30   : > { %936 = dma.done.wait (%p41_p1), [#allocation6], 6176  }
  0x31   : > { %938 = vsyncadd (%p41_p1), [#allocation6], 4294961120  ;;  %v224_v0 = vlaneseq  ;;  %v302_v2 = vld [vmem:[#allocation5 + $0xf8] sm:$0xff]  ;;  %v300_v4 = vld [vmem:[#allocation5 + $0xe8] sm:$0xff]  ;;  %vm303_vm2 = vcmask 523264   ;;  %s695_s18 = sshll.u32 %s1008_s16, 4 }
  0x32   : > { %v285_v3 = vld [vmem:[#allocation5 + $0x78] sm:$0xff]  ;;  %341 = vmatpush.msra.mxu1 %v302_v2  ;;  %v283_v5 = vld [vmem:[#allocation5 + $0x68] sm:$0xff]  ;;  %v301_v11 = vld [vmem:[#allocation5 + $0xf0] sm:$0xff]  ;;  %s566_s27 = scalar_lea.hbm %s1173_s3, %s695_s18  ;;  %s221_s28 = scalar_lea.vmem [#allocation8], %s671_s24 }
  0x33   : > { %v1097_v1 = vshrl.u32 %v224_v0, 7  ;;  %393 = vmatpush.msra.mxu3 %v285_v3  ;;  %v298_v6 = vld [vmem:[#allocation5 + $0xd8] sm:$0xff]  ;;  %v296_v9 = vld [vmem:[#allocation5 + $0xc8] sm:$0xff]  ;;  %v299_v14 = vld [vmem:[#allocation5 + $0xe0] sm:$0xff]  ;;  %318 = vmatpush.msra.mxu0 %v301_v11  ;;  %s567_s16 = sshll.u32 %s221_s28, 4  ;;  %s569_s29 = sshll.u32 %s566_s27, 4  ;;  %s568_s16 = int_to_ptr.vmem [resolvable:$true] %s567_s16  ;;  %s570_s29 = int_to_ptr.hbm [resolvable:$true] %s569_s29 }
  0x34   : > { %v281_v7 = vld [vmem:[#allocation5 + $0x58] sm:$0xff]  ;;  %342 = vmatpush.msra.mxu1 %v300_v4  ;;  %v279_v10 = vld [vmem:[#allocation5 + $0x48] sm:$0xff]  ;;  %v1100_v15 = vld [vmem:[%s188_s30] sm:$0xff]  ;;  %s555_s4 = scalar_lea.sflag [#allocation4], %s1083_s22  ;;  %s901_s5 = sshra.s32 %s570_s29, 4  ;;  %s902_s5 = int_to_ptr.hbm [resolvable:$true] %s901_s5 }
  0x35   : > { %v231_v8 = vand.u32 15, %v1097_v1  ;;  %394 = vmatpush.msra.mxu3 %v283_v5  ;;  %v294_v12 = vld [vmem:[#allocation5 + $0xb8] sm:$0xff]  ;;  %v284_v16 = vld [vmem:[#allocation5 + $0x70] sm:$0xff]  ;;  %v251_v19 = vrot.slane %v1100_v15, 7  ;;  %vm253_vm0 = vcmp.lt.s32.totalorder %v1097_v1, 1  ;;  %v282_v22 = vld [vmem:[#allocation5 + $0x60] sm:$0xff]  ;;  %319 = vmatpush.msra.mxu0 %v299_v14  ;;  %p908_p11 = scmp.lt.s32.totalorder %s902_s5, %s1173_s3 }
  0x36   : > { %343 = vmatpush.msra.mxu1 %v298_v6  ;;  %v277_v13 = vld [vmem:[#allocation5 + $0x38] sm:$0xff]  ;;  %v297_v21 = vld [vmem:[#allocation5 + $0xd0] sm:$0xff]  ;;  %v292_v23 = vld [vmem:[#allocation5 + $0xa8] sm:$0xff]  ;;  %370 = vmatpush.msra.mxu2 %v284_v16  ;;  %v226_v36 = vadd.s32 8, %v1097_v1  ;;  %v408_v48 = vrot.slane %v1100_v15, 1  ;;  %vm410_vm3 = vcmp.lt.s32.totalorder %v1097_v1, 7 }
  0x37   : > { %395 = vmatpush.msra.mxu3 %v281_v7  ;;  %v1102_v17 = vld [vmem:[%s188_s30 + $0x8] sm:$0xff]  ;;  %v256_v18 = vadd.s32 4294967295, %v231_v8  ;;  %v295_v25 = vld [vmem:[#allocation5 + $0xc0] sm:$0xff]  ;;  %v280_v26 = vld [vmem:[#allocation5 + $0x50] sm:$0xff]  ;;  %320 = vmatpush.msra.mxu0 %v297_v21  ;;  %s903_s7 = scalar_lea.hbm %s902_s5, 16  ;;  %s907_s20 = scalar_lea.hbm %s1173_s3, 32 }
  0x38   : > { %344 = vmatpush.msra.mxu1 %v296_v9  ;;  %v252_v20 = vrot.slane %v1102_v17, 7  ;;  %v275_v24 = vld [vmem:[#allocation5 + $0x28] sm:$0xff]  ;;  %v290_v27 = vld [vmem:[#allocation5 + $0x98] sm:$0xff]  ;;  %371 = vmatpush.msra.mxu2 %v282_v22  ;;  %v293_v30 = vld [vmem:[#allocation5 + $0xb0] sm:$0xff]  ;;  %v238_v43 = vand.u32 15, %v226_v36  ;;  %v409_v50 = vrot.slane %v1102_v17, 1  ;;  %p904_p1 = scmp.ne.s32.totalorder %s902_s5, %s903_s7  ;;  %p909_p2 = scmp.lt.s32.totalorder %s907_s20, %s903_s7 }
  0x39   : > { %396 = vmatpush.msra.mxu3 %v279_v10  ;;  %v273_v28 = vld [vmem:[#allocation5 + $0x18] sm:$0xff]  ;;  %vm258_vm1 = vcmp.ge.s32.totalorder %v256_v18, 0  ;;  %v278_v31 = vld [vmem:[#allocation5 + $0x40] sm:$0xff]  ;;  %v288_v32 = vld [vmem:[#allocation5 + $0x88] sm:$0xff]  ;;  %321 = vmatpush.msra.mxu0 %v295_v25 }
  0x3a   : > { %345 = vmatpush.msra.mxu1 %v294_v12  ;;  %v255_v29 = vsel %vm253_vm0, %v252_v20, %v251_v19  ;;  %v271_v33 = vld [vmem:[#allocation5 + $0x8] sm:$0xff]  ;;  %372 = vmatpush.msra.mxu2 %v280_v26  ;;  %v443_v35 = vld [vmem:[#allocation5 + $0x178] sm:$0xff]  ;;  %v291_v37 = vld [vmem:[#allocation5 + $0xa0] sm:$0xff]  ;;  %v254_v47 = vsel %vm253_vm0, %v251_v19, %v252_v20  ;;  %v414_v51 = vadd.s32 1, %v238_v43  ;;  %v412_v56 = vsel %vm410_vm3, %v409_v50, %v408_v48  ;;  %p905_p4 = pnand %p904_p1, %p1053_p3  ;;  %p910_p9 = por %p909_p2, %p908_p11 }
  0x3b   : > { %397 = vmatpush.msra.mxu3 %v277_v13  ;;  %v268_v34 = vsel %vm258_vm1, %v255_v29, 0.0  ;;  %322 = vmatpush.msra.mxu0 %v293_v30  ;;  %v276_v38 = vld [vmem:[#allocation5 + $0x30] sm:$0xff]  ;;  %v441_v39 = vld [vmem:[#allocation5 + $0x168] sm:$0xff]  ;;  %v274_v41 = vld [vmem:[#allocation5 + $0x20] sm:$0xff]  ;;  %v411_v59 = vsel %vm410_vm3, %v408_v48, %v409_v50 }
  0x3c   : > { %346 = vmatpush.msra.mxu1 %v292_v23  ;;  %373 = vmatpush.msra.mxu2 %v278_v31  ;;  %v289_v40 = vld [vmem:[#allocation5 + $0x90] sm:$0xff]  ;;  %v439_v42 = vld [vmem:[#allocation5 + $0x158] sm:$0xff]  ;;  %v287_v44 = vld [vmem:[#allocation5 + $0x80] sm:$0xff]  ;;  %vm418_vm4 = vcmp.lt.s32.totalorder %v414_v51, 16  ;;  %p906_p8 = pneg %p905_p4 }
  0x3d   : > { %398 = vmatpush.msra.mxu3 %v275_v24  ;;  %323 = vmatpush.msra.mxu0 %v291_v37  ;;  %v272_v45 = vld [vmem:[#allocation5 + $0x10] sm:$0xff]  ;;  %v437_v46 = vld [vmem:[#allocation5 + $0x148] sm:$0xff]  ;;  %v435_v49 = vld [vmem:[#allocation5 + $0x138] sm:$0xff]  ;;  %v426_v60 = vsel %vm418_vm4, %v412_v56, 0.0 }
  0x3e   : > { %347 = vmatpush.msra.mxu1 %v290_v27  ;;  %374 = vmatpush.msra.mxu2 %v276_v38  ;;  %v270_v52 = vld [vmem:[#allocation5] sm:$0xff]  ;;  %v433_v53 = vld [vmem:[#allocation5 + $0x128] sm:$0xff]  ;;  %v442_v54 = vld [vmem:[#allocation5 + $0x170] sm:$0xff]  ;;  %p911_p10 = pnand %p910_p9, %p906_p8 }
  0x3f   : > { %399 = vmatpush.msra.mxu3 %v273_v28  ;;  %324 = vmatpush.msra.mxu0 %v289_v40  ;;  %v431_v55 = vld [vmem:[#allocation5 + $0x118] sm:$0xff]  ;;  %v440_v57 = vld [vmem:[#allocation5 + $0x160] sm:$0xff]  ;;  %v429_v58 = vld [vmem:[#allocation5 + $0x108] sm:$0xff] }
  0x40   : > { %348 = vmatpush.msra.mxu1 %v288_v32  ;;  %375 = vmatpush.msra.mxu2 %v274_v41  ;;  %v438_v61 = vld [vmem:[#allocation5 + $0x150] sm:$0xff]  ;;  %v436_v62 = vld [vmem:[#allocation5 + $0x140] sm:$0xff] }
  0x41   : > { %400 = vmatpush.msra.mxu3 %v271_v33  ;;  %677 = vmatmul.msk.f32.vlgmr.msra.gmra.mxu1 %vm303_vm2, %v1100_v15  ;;  %v434_v63 = vld [vmem:[#allocation5 + $0x130] sm:$0xff]  ;;  %v432_v0 = vld [vmem:[#allocation5 + $0x120] sm:$0xff] }
  0x42   : > { %681 = vmatmul.msk.f32.vlgmr.msra.gmra.mxu3 %vm303_vm2, %v268_v34  ;;  %481 = vmatpush.msrb.mxu1 %v443_v35  ;;  %v430_v1 = vld [vmem:[#allocation5 + $0x110] sm:$0xff]  ;;  %v428_v2 = vld [vmem:[#allocation5 + $0x100] sm:$0xff] }
  0x43   : > { %704 = vmatpush.msrb.mxu3 %v443_v35  ;;  %325 = vmatpush.msra.mxu0 %v287_v44  ;;  %v500_v7 = vld [vmem:[#allocation7] sm:$0x3] }
  0x44   : > { %482 = vmatpush.msrb.mxu1 %v441_v39  ;;  %376 = vmatpush.msra.mxu2 %v272_v45  ;;  %v503_v10 = vperm.slane %v500_v7, 1  ;;  %v502_v28 = vperm.slane %v500_v7, 0 }
  0x45   : > { %705 = vmatpush.msrb.mxu3 %v441_v39  ;;  %675 = vmatmul.msk.f32.vlgmr.msra.gmra.mxu0 %vm303_vm2, %v1100_v15 }
  0x46   : > { %483 = vmatpush.msrb.mxu1 %v439_v42  ;;  %377 = vmatpush.msra.mxu2 %v270_v52 }
  0x47   : > { %706 = vmatpush.msrb.mxu3 %v439_v42  ;;  %458 = vmatpush.msrb.mxu0 %v442_v54 }
  0x48   : > { %484 = vmatpush.msrb.mxu1 %v437_v46  ;;  %679 = vmatmul.msk.f32.vlgmr.msra.gmra.mxu2 %vm303_vm2, %v268_v34 }
  0x49   : > { %707 = vmatpush.msrb.mxu3 %v437_v46  ;;  %678 = vmatmul.msk.f32.gmra.mxu1 %vm303_vm2, %v1102_v17 }
  0x4a   : > { %682 = vmatmul.msk.f32.gmra.mxu3 %vm303_vm2, %v254_v47  ;;  %485 = vmatpush.msrb.mxu1 %v435_v49 }
  0x4b   : > { %708 = vmatpush.msrb.mxu3 %v435_v49  ;;  %696 = vmatpush.msrb.mxu2 %v442_v54 }
  0x4c   : > { %486 = vmatpush.msrb.mxu1 %v433_v53  ;;  %459 = vmatpush.msrb.mxu0 %v440_v57 }
  0x4d   : > { %709 = vmatpush.msrb.mxu3 %v433_v53  ;;  %697 = vmatpush.msrb.mxu2 %v440_v57 }
  0x4e   : > { %487 = vmatpush.msrb.mxu1 %v431_v55  ;;  %460 = vmatpush.msrb.mxu0 %v438_v61 }
  0x4f   : > { %710 = vmatpush.msrb.mxu3 %v431_v55  ;;  %676 = vmatmul.msk.f32.gmra.mxu0 %vm303_vm2, %v1102_v17 }
  0x50   : > { %488 = vmatpush.msrb.mxu1 %v429_v58  ;;  %698 = vmatpush.msrb.mxu2 %v438_v61 }
  0x51   : > { %711 = vmatpush.msrb.mxu3 %v429_v58  ;;  %685 = vmatmul.msk.f32.vlgmr.msrb.gmra.mxu1 %vm303_vm2, %v411_v59 }
  0x52   : > { %686 = vmatmul.msk.f32.vlgmr.msrb.gmra.mxu3 %vm303_vm2, %v426_v60  ;;  %461 = vmatpush.msrb.mxu0 %v436_v62 }
  0x53   : > { %680 = vmatmul.msk.f32.gmra.mxu2 %vm303_vm2, %v254_v47 }
  0x54   : > { %699 = vmatpush.msrb.mxu2 %v436_v62  ;;  %462 = vmatpush.msrb.mxu0 %v434_v63 }
  0x56   : > { %700 = vmatpush.msrb.mxu2 %v434_v63  ;;  %463 = vmatpush.msrb.mxu0 %v432_v0 }
  0x58   : > { %701 = vmatpush.msrb.mxu2 %v432_v0  ;;  %464 = vmatpush.msrb.mxu0 %v430_v1 }
  0x5a   : > { %702 = vmatpush.msrb.mxu2 %v430_v1  ;;  %465 = vmatpush.msrb.mxu0 %v428_v2 }
  0x5b   : > { %683 = vmatmul.msk.f32.vlgmr.msrb.gmra.mxu0 %vm303_vm2, %v411_v59 }
  0x5c   : > { %703 = vmatpush.msrb.mxu2 %v428_v2 }
  0x5d   : > { %684 = vmatmul.msk.f32.vlgmr.msrb.gmra.mxu2 %vm303_vm2, %v426_v60 }
  0xbe   : > { %v350_v3 = vpop.f32.mrf.mxu1 }
  0xc2   : > { %v327_v6 = vpop.f32.mrf.mxu0 }
  0xc5   : > { %v402_v4 = vpop.f32.mrf.mxu3 }
  0xc6   : > { %v353_v5 = vpop.f32.mrf.mxu1  ;;  %v403_v9 = vadd.f32 %v402_v4, %v350_v3 }
  0xcb   : > { %v379_v13 = vpop.f32.mrf.mxu2 }
  0xcc   : > { %v330_v17 = vpop.f32.mrf.mxu0  ;;  %v380_v25 = vadd.f32 %v379_v13, %v327_v6 }
  0xcd   : > { %v405_v8 = vpop.f32.mrf.mxu3 }
  0xce   : > { %v490_v11 = vpop.f32.mrf.mxu1  ;;  %v406_v15 = vadd.f32 %v405_v8, %v353_v5 }
  0xcf   : > { %v497_v12 = vadd.f32 %v490_v11, %v403_v9 }
  0xd1   : > { %v507_v14 = vadd.f32 %v503_v10, %v497_v12 }
  0xd3   : > { %v687_v16 = vmul.f32 -1.442695, %v507_v14 }
  0xd5   : > { %v493_v18 = vpop.f32.mrf.mxu3  ;;  %785 = vpow2.f32 %v687_v16 }
  0xd6   : > { %v499_v19 = vadd.f32 %v493_v18, %v406_v15  ;;  %v382_v22 = vpop.f32.mrf.mxu2 }
  0xd7   : > { %v383_v31 = vadd.f32 %v382_v22, %v330_v17 }
  0xd8   : > { %v509_v20 = vadd.f32 %v503_v10, %v499_v19  ;;  %v467_v26 = vpop.f32.mrf.mxu0 }
  0xd9   : > { %v496_v27 = vadd.f32 %v467_v26, %v380_v25 }
  0xda   : > { %v688_v21 = vmul.f32 -1.442695, %v509_v20 }
  0xdb   : > { %v786_v23 = vpop.eup %785  ;;  %v506_v34 = vadd.f32 %v502_v28, %v496_v27 }
  0xdc   : > { %787 = vpow2.f32 %v688_v21  ;;  %v518_v24 = vadd.f32 1.0, %v786_v23 }
  0xde   : > { %789 = vrcp.f32 %v518_v24  ;;  %v531_v38 = vand.u32 2147483648, %v518_v24  ;;  %v529_v40 = vand.u32 2147483647, %v518_v24  ;;  %vm525_vm6 = vweird.f32 %v518_v24 }
  0xe0   : > { %v470_v32 = vpop.f32.mrf.mxu2  ;;  %v532_v45 = vor.u32 1.1754944e-38, %v531_v38  ;;  %vm530_vm8 = vcmp.eq.f32.partialorder %v529_v40, 8.507059e+37 }
  0xe1   : > { %v498_v36 = vadd.f32 %v470_v32, %v383_v31 }
  0xe2   : > { %v788_v29 = vpop.eup %787 }
  0xe3   : > { %v519_v30 = vadd.f32 1.0, %v788_v29  ;;  %v508_v42 = vadd.f32 %v502_v28, %v498_v36 }
  0xe4   : > { %v790_v33 = vpop.eup %789 }
  0xe5   : > { %791 = vrcp.f32 %v519_v30  ;;  %v521_v35 = vmul.f32 %v790_v33, %v518_v24  ;;  %vm526_vm5 = vweird.f32 %v790_v33  ;;  %v546_v50 = vand.u32 2147483648, %v519_v30 }
  0xe6   : > { %793 = vtanh.f32 %v506_v34  ;;  %vm527_vm7 = vmor %vm525_vm6, %vm526_vm5  ;;  %v544_v53 = vand.u32 2147483647, %v519_v30  ;;  %vm540_vm10 = vweird.f32 %v519_v30 }
  0xe7   : > { %v522_v37 = vsub.f32 1.0, %v521_v35  ;;  %795 = vtanh.f32 %v508_v42  ;;  %v547_v55 = vor.u32 1.1754944e-38, %v546_v50 }
  0xe8   : > { %vm545_vm12 = vcmp.eq.f32.partialorder %v544_v53, 8.507059e+37 }
  0xe9   : > { %v523_v39 = vmul.f32 %v790_v33, %v522_v37 }
  0xeb   : > { %v792_v41 = vpop.eup %791  ;;  %v524_v44 = vadd.f32 %v790_v33, %v523_v39 }
  0xec   : > { %v536_v43 = vmul.f32 %v792_v41, %v519_v30  ;;  %v794_v48 = vpop.eup %793  ;;  %vm541_vm9 = vweird.f32 %v792_v41 }
  0xed   : > { %v528_v47 = vsel %vm527_vm7, %v790_v33, %v524_v44  ;;  %vm542_vm11 = vmor %vm540_vm10, %vm541_vm9  ;;  %v796_v57 = vpop.eup %795 }
  0xee   : > { %v537_v46 = vsub.f32 1.0, %v536_v43  ;;  %v533_v49 = vsel %vm530_vm8, %v532_v45, %v528_v47 }
  0xef   : > { %v550_v51 = vmul.f32 %v794_v48, %v533_v49 }
  0xf0   : > { %v538_v52 = vmul.f32 %v792_v41, %v537_v46 }
  0xf1   : > { %552 = vst [vmem:[%s221_s28] sm:$0xff] %v550_v51 }
  0xf2   : > { %v539_v54 = vadd.f32 %v792_v41, %v538_v52 }
  0xf4   : > { %v543_v56 = vsel %vm542_vm11, %v792_v41, %v539_v54 }
  0xf5   : > { %v548_v58 = vsel %vm545_vm12, %v547_v55, %v543_v56 }
  0xf6   : > { %v551_v59 = vmul.f32 %v796_v57, %v548_v58 }
  0xf8   : > { %553 = vst [vmem:[%s221_s28 + $0x8] sm:$0xff] %v551_v59 }
  0xf9   : > { %914 = shalt.err (!%p911_p10)
}
  0xfa   : > { %s965_s22 = smov 128   ;;  %s966_s24 = smov 8  }
  0xfb   : > { %722 = dma.vmem_to_hbm [thread:$0]  (%p1053_p3), %s568_s16, 256, %s570_s29, %s555_s4, %s965_s22, %s965_s22, %s966_s24  }
  0xfc PF: > { %s584_s25 = sand.u32 1, %s945_s12   ;;  %p1179_p12 = scmp.ge.s32.totalorder %s957_s15, 2 }
  0xfd   : > { %s585_s30 = scalar_lea.sflag [#allocation4], %s584_s25 }
  0xfe   : > { %p736_p13 = pnand %p1179_p12, %p1022_p6 }
 0x100   : > { %p737_p0 = pneg %p736_p13 }
 0x102   : > { %940 = dma.done.wait (%p737_p0), %s585_s30, 256  }
 0x103   : > { %942 = vsyncadd (%p737_p0), %s585_s30, 4294967040  ;;  %p17_p5 = scmp.ge.s32.totalorder %s1043_s6, 4   ;;  %s1180_s12 = smov %s949_s13 }
 0x104   : > { %s1181_s13 = smov %s953_s14  ;;  %s1182_s14 = smov %s1059_s10 }
 0x105   : > { %s1183_s15 = smov %s1043_s6  ;;  %19 = sbr.rel (!%p17_p5) target bundleno = 6 (0x6), region = 87 }
 0x10a   :  { %591 = vsyncpa [#allocation3], 1 }
 0x10b   :  { %593 = vsyncpa [#allocation3 + $0x1], 1 }
 0x10c   :  { %594 = vsyncpa [#allocation6], 1 }
 0x10d   :  { %595 = vsyncpa [#allocation4], 1 }
 0x10e   :  { %597 = vsyncpa [#allocation4 + $0x1], 1 }

</bundles_post_ra>
